<compile_context>
chip_gen: v7x
topology: tpu7x:2x2x1
jax: 0.10.0
libtpu: 0.0.40
codegen_flags: <defaults>
</compile_context>

<pallas_src>
import functools
import math

import jax
import jax.numpy as jnp
from jax import lax
from jax.experimental import pallas as pl
from jax.experimental.pallas import tpu as pltpu


def _round_up(x, m):
    return ((x + m - 1) // m) * m


def _encoder_kernel(Wp, HWp,
                    x_ref, wtaps_ref, bconv_ref, mask_ref, wfc_ref, bfc_ref,
                    q_ref):
    """One batch image per grid step.

    x_ref     : (1, C, L)        bf16   spatially padded image, flattened (Hp*Wp), W on lanes
    wtaps_ref : (9, HIDDEN_P, C) bf16   per-tap conv weights, [kh*3+kw, o, c] = w_conv[o,c,kh,kw]
    bconv_ref : (HIDDEN_P, 1)    f32
    mask_ref  : (1, L)           f32    1.0 where (p % Wp) < W (valid output column)
    wfc_ref   : (DIMP, HIDDEN_P) bf16   fc weight (column form) with 1/HW folded in
    bfc_ref   : (DIMP, 1)        f32
    q_ref     : (1, DIMP, 1)     f32
    """
    x = x_ref[0]                                            # (C, L) bf16
    hidden_p = wtaps_ref.shape[1]

    # 3x3 conv as 9 shifted-slice sub-matmuls, f32 accumulation on the MXU.
    acc = jnp.zeros((hidden_p, HWp), jnp.float32)
    for kh in range(3):
        for kw in range(3):
            off = kh * Wp + kw
            tap = x[:, off:off + HWp]                       # (C, HWp) shifted view
            acc = acc + jnp.dot(wtaps_ref[kh * 3 + kw], tap,
                                preferred_element_type=jnp.float32)

    conv = jnp.maximum(acc + bconv_ref[...], 0.0)           # bias + ReLU
    # Zero the Wp-padding columns (w >= W): they mix pad zeros with wrapped
    # pixels from the next image row and must not enter the pooled sum.
    conv = conv * mask_ref[:, :HWp]

    # Global-average-pool as a lane reduction (1/HW folded into wfc).
    pooled = jnp.sum(conv, axis=1, keepdims=True)           # (HIDDEN_P, 1) f32

    # fc: q = wfc @ pooled + bfc   (column orientation -> no in-kernel transpose)
    q = jnp.dot(wfc_ref[...], pooled.astype(wfc_ref.dtype),
                preferred_element_type=jnp.float32) + bfc_ref[...]   # (DIMP, 1)
    q_ref[...] = q.reshape(q_ref.shape)


def _decoder_kernel(q_ref, wdec_ref, bdec_ref, out_ref):
    """recon tile = q (BP, DIMP) @ wdec tile (DIMP, TP) + bdec tile."""
    out_ref[...] = (jnp.dot(q_ref[...], wdec_ref[...],
                            preferred_element_type=jnp.float32)
                    + bdec_ref[...])


def moco_forward(im_q, im_k, params, outshape):
    """im_q, im_k: (B, C, H, W) float32 (NCHW).  im_k is unused (as in MoCo.forward)."""
    del im_k  # MoCo.forward never uses im_k for the returned recon
    B, C, H, W = im_q.shape
    HW = H * W
    w_conv, b_conv, w_fc, b_fc, w_dec, b_dec = params
    hidden = w_conv.shape[0]
    dim = w_fc.shape[0]
    P = w_dec.shape[0]
    assert P == math.prod(outshape)

    Hp, Wp = H + 2, W + 2
    HWp = H * Wp
    # Flattened padded-image length; +Wp slack keeps every tap slice in bounds,
    # rounded to 128 lanes.  Streamed bytes ~ raw image (no 9x im2col, no K pad).
    L = _round_up(Hp * Wp + Wp, 128)

    HIDDEN_P = _round_up(hidden, 8)
    DIMP = _round_up(dim, 128)

    # ---- image prep: spatial zero-pad + flatten (H,W)->Hp*Wp, cast bf16 ------
    x_pad = jnp.pad(im_q, ((0, 0), (0, 0), (1, 1), (1, 1)))        # (B, C, Hp, Wp)
    x_flat = x_pad.reshape(B, C, Hp * Wp)
    x_flat = jnp.pad(x_flat, ((0, 0), (0, 0), (0, L - Hp * Wp))).astype(jnp.bfloat16)

    # Per-tap conv weights: wtaps[kh*3+kw, o, c] = w_conv[o, c, kh, kw].
    wtaps = jnp.zeros((9, HIDDEN_P, C), jnp.bfloat16)
    wtaps = wtaps.at[:, :hidden, :].set(
        w_conv.transpose(2, 3, 0, 1).reshape(9, hidden, C).astype(jnp.bfloat16))
    bconv_m = jnp.zeros((HIDDEN_P, 1), jnp.float32).at[:hidden, 0].set(b_conv)

    # Valid-output-column mask over flattened positions p = h*Wp + w.
    col = jnp.arange(L, dtype=jnp.int32)
    mask = ((col % Wp) < W).astype(jnp.float32).reshape(1, L)

    # fc weight in column orientation with the 1/HW GAP scale folded in.
    # (bf16 weights + folded scale differ in rounding from the fp32 reference;
    #  tolerance-checked in __main__.)
    wfc_m = jnp.zeros((DIMP, HIDDEN_P), jnp.bfloat16)
    wfc_m = wfc_m.at[:dim, :hidden].set((w_fc / HW).astype(jnp.bfloat16))
    bfc_m = jnp.zeros((DIMP, 1), jnp.float32).at[:dim, 0].set(b_fc)

    flops_enc = 2 * B * 9 * C * HWp * HIDDEN_P + 2 * B * HIDDEN_P * DIMP
    bytes_enc = (B * C * L * 2 + 9 * HIDDEN_P * C * 2 + HIDDEN_P * 4 + L * 4
                 + DIMP * HIDDEN_P * 2 + DIMP * 4 + B * DIMP * 4)

    # ---- call 1: encoder (conv + ReLU + GAP + fc), one image per grid step ---
    q_col = pl.pallas_call(
        functools.partial(_encoder_kernel, Wp, HWp),
        out_shape=jax.ShapeDtypeStruct((B, DIMP, 1), jnp.float32),
        grid=(B,),
        in_specs=[
            pl.BlockSpec((1, C, L), lambda b: (b, 0, 0)),           # image (streamed)
            pl.BlockSpec((9, HIDDEN_P, C), lambda b: (0, 0, 0)),    # conv taps (resident)
            pl.BlockSpec((HIDDEN_P, 1), lambda b: (0, 0)),          # conv bias
            pl.BlockSpec((1, L), lambda b: (0, 0)),                 # valid-column mask
            pl.BlockSpec((DIMP, HIDDEN_P), lambda b: (0, 0)),       # fc weight (w/ 1/HW)
            pl.BlockSpec((DIMP, 1), lambda b: (0, 0)),              # fc bias
        ],
        out_specs=pl.BlockSpec((1, DIMP, 1), lambda b: (b, 0, 0)),
        compiler_params=pltpu.CompilerParams(
            dimension_semantics=("parallel",),        # batches shard across v7x cores
            vmem_limit_bytes=32 * 1024 * 1024),
        cost_estimate=pl.CostEstimate(flops=flops_enc, transcendentals=0,
                                      bytes_accessed=bytes_enc),
    )(x_flat, wtaps, bconv_m, mask, wfc_m, bfc_m)

    # ---- call 2: decoder Linear(dim -> P), tiled over P columns --------------
    BP = _round_up(max(B, 8), 8)
    TP = min(512, _round_up(P, 128))
    PP = _round_up(P, TP)
    NP = PP // TP

    # q round-trips through HBM (tiny: B x dim). Padded rows are zero and only
    # produce bias rows that are sliced off below.
    q_rows = jnp.zeros((BP, DIMP), jnp.bfloat16)
    q_rows = q_rows.at[:B].set(q_col[:, :, 0].astype(jnp.bfloat16))

    wdec_m = jnp.zeros((DIMP, PP), jnp.bfloat16)
    wdec_m = wdec_m.at[:dim, :P].set(w_dec.T.astype(jnp.bfloat16))
    bdec_m = jnp.zeros((1, PP), jnp.float32).at[0, :P].set(b_dec)

    flops_dec = 2 * BP * DIMP * PP
    bytes_dec = DIMP * PP * 2 + BP * DIMP * 2 + PP * 4 + BP * PP * 4

    recon_p = pl.pallas_call(
        _decoder_kernel,
        out_shape=jax.ShapeDtypeStruct((BP, PP), jnp.float32),
        grid=(NP,),
        in_specs=[
            pl.BlockSpec((BP, DIMP), lambda p: (0, 0)),             # q (resident, tiny)
            pl.BlockSpec((DIMP, TP), lambda p: (0, p)),             # decoder weight (streamed)
            pl.BlockSpec((1, TP), lambda p: (0, p)),                # decoder bias
        ],
        out_specs=pl.BlockSpec((BP, TP), lambda p: (0, p)),
        compiler_params=pltpu.CompilerParams(
            dimension_semantics=("parallel",),        # independent P tiles
            vmem_limit_bytes=32 * 1024 * 1024),
        cost_estimate=pl.CostEstimate(flops=flops_dec, transcendentals=0,
                                      bytes_accessed=bytes_dec),
    )(q_rows, wdec_m, bdec_m)

    return recon_p[:B, :P].reshape((B,) + tuple(outshape))


def init_params(key, channels, hidden, dim, outshape):
    P = math.prod(outshape)
    k = jax.random.split(key, 6)
    w_conv = jax.random.normal(k[0], (hidden, channels, 3, 3), jnp.float32) * 0.05
    b_conv = jax.random.normal(k[1], (hidden,), jnp.float32) * 0.01
    w_fc = jax.random.normal(k[2], (dim, hidden), jnp.float32) * 0.05
    b_fc = jax.random.normal(k[3], (dim,), jnp.float32) * 0.01
    w_dec = jax.random.normal(k[4], (P, dim), jnp.float32) * 0.05
    b_dec = jax.random.normal(k[5], (P,), jnp.float32) * 0.01
    return (w_conv, b_conv, w_fc, b_fc, w_dec, b_dec)


if __name__ == "__main__":
    B, C, H, W = 2, 4, 16, 16
    hidden, dim = 32, 128
    outshape = (C, H, W)          # decoder reconstructs an image of the input shape

    key = jax.random.PRNGKey(0)
    kq, kk, kp = jax.random.split(key, 3)
    im_q = jax.random.normal(kq, (B, C, H, W), jnp.float32)
    im_k = jax.random.normal(kk, (B, C, H, W), jnp.float32)   # unused, as in MoCo.forward
    params = init_params(kp, C, hidden, dim, outshape)

    fwd = jax.jit(moco_forward, static_argnums=(3,))
    recon = fwd(im_q, im_k, params, outshape)
    recon = jax.block_until_ready(recon)
    assert recon.shape == (B,) + outshape

    # Pure-JAX fp32 reference (loose tolerance: kernel uses bf16 weights/inputs).
    w_conv, b_conv, w_fc, b_fc, w_dec, b_dec = params
    conv_r = lax.conv_general_dilated(
        im_q, w_conv, window_strides=(1, 1), padding=((1, 1), (1, 1)),
        dimension_numbers=("NCHW", "OIHW", "NCHW"))
    conv_r = jnp.maximum(conv_r + b_conv[None, :, None, None], 0.0)
    pooled_r = conv_r.mean(axis=(2, 3))
    q_r = pooled_r @ w_fc.T + b_fc
    recon_r = (q_r @ w_dec.T + b_dec).reshape((B,) + outshape)
    err = float(jnp.max(jnp.abs(recon - recon_r)))
    assert err < 3e-2, f"kernel vs reference max abs err {err}"

    print("KERNEL_OK")
</pallas_src>

<mosaic_0001>
module attributes {stable_mosaic.version = 11 : i64} {
  func.func @_encoder_kernel(%arg0: i32, %arg1: memref<1x4x384xbf16, #tpu.memory_space<vmem>>, %arg2: memref<9x32x4xbf16, #tpu.memory_space<vmem>>, %arg3: memref<32x1xf32, #tpu.memory_space<vmem>>, %arg4: memref<1x384xf32, #tpu.memory_space<vmem>>, %arg5: memref<128x32xbf16, #tpu.memory_space<vmem>>, %arg6: memref<128x1xf32, #tpu.memory_space<vmem>>, %arg7: memref<1x128x1xf32, #tpu.memory_space<vmem>>) attributes {dimension_semantics = [#tpu.dimension_semantics<parallel>], iteration_bounds = array<i64: 2>, scalar_prefetch = 0 : i64, scratch_operands = 0 : i64, tpu.core_type = #tpu.core_type<tc>, window_params = [{transform_indices = @transform_0, window_bounds = array<i64: 1, 4, 384>}, {pipeline_mode = #tpu.pipeline_mode<synchronous>, transform_indices = @transform_1, window_bounds = array<i64: 9, 32, 4>}, {pipeline_mode = #tpu.pipeline_mode<synchronous>, transform_indices = @transform_2, window_bounds = array<i64: 32, 1>}, {pipeline_mode = #tpu.pipeline_mode<synchronous>, transform_indices = @transform_3, window_bounds = array<i64: 1, 384>}, {pipeline_mode = #tpu.pipeline_mode<synchronous>, transform_indices = @transform_4, window_bounds = array<i64: 128, 32>}, {pipeline_mode = #tpu.pipeline_mode<synchronous>, transform_indices = @transform_5, window_bounds = array<i64: 128, 1>}, {transform_indices = @transform_6, window_bounds = array<i64: 1, 128, 1>}]} {
    %c0 = arith.constant 0 : index
    %c0_0 = arith.constant 0 : index
    %c0_1 = arith.constant 0 : index
    %0 = vector.load %arg1[%c0, %c0_0, %c0_1] : memref<1x4x384xbf16, #tpu.memory_space<vmem>>, vector<1x4x384xbf16>
    %1 = vector.shape_cast %0 : vector<1x4x384xbf16> to vector<4x384xbf16>
    %cst = arith.constant 0.000000e+00 : f32
    %2 = vector.broadcast %cst : f32 to vector<32x288xf32>
    %3 = vector.extract_strided_slice %1 {offsets = [0, 0], sizes = [4, 288], strides = [1, 1]} : vector<4x384xbf16> to vector<4x288xbf16>
    %c0_2 = arith.constant 0 : index
    %c0_3 = arith.constant 0 : index
    %c0_4 = arith.constant 0 : index
    %4 = vector.load %arg2[%c0_2, %c0_3, %c0_4] : memref<9x32x4xbf16, #tpu.memory_space<vmem>>, vector<1x32x4xbf16>
    %5 = vector.shape_cast %4 : vector<1x32x4xbf16> to vector<32x4xbf16>
    %cst_5 = arith.constant dense<0.000000e+00> : vector<32x288xf32>
    %6 = tpu.matmul %5, %3, %cst_5 {dimension_numbers = #tpu.dot_dimension_numbers<[1], [0], [0], [1], [0, 0, 1, 1], [], []>} : vector<32x4xbf16>, vector<4x288xbf16>, vector<32x288xf32> -> vector<32x288xf32>
    %7 = arith.addf %2, %6 : vector<32x288xf32>
    %8 = vector.extract_strided_slice %1 {offsets = [0, 1], sizes = [4, 288], strides = [1, 1]} : vector<4x384xbf16> to vector<4x288xbf16>
    %c1 = arith.constant 1 : index
    %c0_6 = arith.constant 0 : index
    %c0_7 = arith.constant 0 : index
    %9 = vector.load %arg2[%c1, %c0_6, %c0_7] : memref<9x32x4xbf16, #tpu.memory_space<vmem>>, vector<1x32x4xbf16>
    %10 = vector.shape_cast %9 : vector<1x32x4xbf16> to vector<32x4xbf16>
    %cst_8 = arith.constant dense<0.000000e+00> : vector<32x288xf32>
    %11 = tpu.matmul %10, %8, %cst_8 {dimension_numbers = #tpu.dot_dimension_numbers<[1], [0], [0], [1], [0, 0, 1, 1], [], []>} : vector<32x4xbf16>, vector<4x288xbf16>, vector<32x288xf32> -> vector<32x288xf32>
    %12 = arith.addf %7, %11 : vector<32x288xf32>
    %13 = vector.extract_strided_slice %1 {offsets = [0, 2], sizes = [4, 288], strides = [1, 1]} : vector<4x384xbf16> to vector<4x288xbf16>
    %c2 = arith.constant 2 : index
    %c0_9 = arith.constant 0 : index
    %c0_10 = arith.constant 0 : index
    %14 = vector.load %arg2[%c2, %c0_9, %c0_10] : memref<9x32x4xbf16, #tpu.memory_space<vmem>>, vector<1x32x4xbf16>
    %15 = vector.shape_cast %14 : vector<1x32x4xbf16> to vector<32x4xbf16>
    %cst_11 = arith.constant dense<0.000000e+00> : vector<32x288xf32>
    %16 = tpu.matmul %15, %13, %cst_11 {dimension_numbers = #tpu.dot_dimension_numbers<[1], [0], [0], [1], [0, 0, 1, 1], [], []>} : vector<32x4xbf16>, vector<4x288xbf16>, vector<32x288xf32> -> vector<32x288xf32>
    %17 = arith.addf %12, %16 : vector<32x288xf32>
    %18 = vector.extract_strided_slice %1 {offsets = [0, 18], sizes = [4, 288], strides = [1, 1]} : vector<4x384xbf16> to vector<4x288xbf16>
    %c3 = arith.constant 3 : index
    %c0_12 = arith.constant 0 : index
    %c0_13 = arith.constant 0 : index
    %19 = vector.load %arg2[%c3, %c0_12, %c0_13] : memref<9x32x4xbf16, #tpu.memory_space<vmem>>, vector<1x32x4xbf16>
    %20 = vector.shape_cast %19 : vector<1x32x4xbf16> to vector<32x4xbf16>
    %cst_14 = arith.constant dense<0.000000e+00> : vector<32x288xf32>
    %21 = tpu.matmul %20, %18, %cst_14 {dimension_numbers = #tpu.dot_dimension_numbers<[1], [0], [0], [1], [0, 0, 1, 1], [], []>} : vector<32x4xbf16>, vector<4x288xbf16>, vector<32x288xf32> -> vector<32x288xf32>
    %22 = arith.addf %17, %21 : vector<32x288xf32>
    %23 = vector.extract_strided_slice %1 {offsets = [0, 19], sizes = [4, 288], strides = [1, 1]} : vector<4x384xbf16> to vector<4x288xbf16>
    %c4 = arith.constant 4 : index
    %c0_15 = arith.constant 0 : index
    %c0_16 = arith.constant 0 : index
    %24 = vector.load %arg2[%c4, %c0_15, %c0_16] : memref<9x32x4xbf16, #tpu.memory_space<vmem>>, vector<1x32x4xbf16>
    %25 = vector.shape_cast %24 : vector<1x32x4xbf16> to vector<32x4xbf16>
    %cst_17 = arith.constant dense<0.000000e+00> : vector<32x288xf32>
    %26 = tpu.matmul %25, %23, %cst_17 {dimension_numbers = #tpu.dot_dimension_numbers<[1], [0], [0], [1], [0, 0, 1, 1], [], []>} : vector<32x4xbf16>, vector<4x288xbf16>, vector<32x288xf32> -> vector<32x288xf32>
    %27 = arith.addf %22, %26 : vector<32x288xf32>
    %28 = vector.extract_strided_slice %1 {offsets = [0, 20], sizes = [4, 288], strides = [1, 1]} : vector<4x384xbf16> to vector<4x288xbf16>
    %c5 = arith.constant 5 : index
    %c0_18 = arith.constant 0 : index
    %c0_19 = arith.constant 0 : index
    %29 = vector.load %arg2[%c5, %c0_18, %c0_19] : memref<9x32x4xbf16, #tpu.memory_space<vmem>>, vector<1x32x4xbf16>
    %30 = vector.shape_cast %29 : vector<1x32x4xbf16> to vector<32x4xbf16>
    %cst_20 = arith.constant dense<0.000000e+00> : vector<32x288xf32>
    %31 = tpu.matmul %30, %28, %cst_20 {dimension_numbers = #tpu.dot_dimension_numbers<[1], [0], [0], [1], [0, 0, 1, 1], [], []>} : vector<32x4xbf16>, vector<4x288xbf16>, vector<32x288xf32> -> vector<32x288xf32>
    %32 = arith.addf %27, %31 : vector<32x288xf32>
    %33 = vector.extract_strided_slice %1 {offsets = [0, 36], sizes = [4, 288], strides = [1, 1]} : vector<4x384xbf16> to vector<4x288xbf16>
    %c6 = arith.constant 6 : index
    %c0_21 = arith.constant 0 : index
    %c0_22 = arith.constant 0 : index
    %34 = vector.load %arg2[%c6, %c0_21, %c0_22] : memref<9x32x4xbf16, #tpu.memory_space<vmem>>, vector<1x32x4xbf16>
    %35 = vector.shape_cast %34 : vector<1x32x4xbf16> to vector<32x4xbf16>
    %cst_23 = arith.constant dense<0.000000e+00> : vector<32x288xf32>
    %36 = tpu.matmul %35, %33, %cst_23 {dimension_numbers = #tpu.dot_dimension_numbers<[1], [0], [0], [1], [0, 0, 1, 1], [], []>} : vector<32x4xbf16>, vector<4x288xbf16>, vector<32x288xf32> -> vector<32x288xf32>
    %37 = arith.addf %32, %36 : vector<32x288xf32>
    %38 = vector.extract_strided_slice %1 {offsets = [0, 37], sizes = [4, 288], strides = [1, 1]} : vector<4x384xbf16> to vector<4x288xbf16>
    %c7 = arith.constant 7 : index
    %c0_24 = arith.constant 0 : index
    %c0_25 = arith.constant 0 : index
    %39 = vector.load %arg2[%c7, %c0_24, %c0_25] : memref<9x32x4xbf16, #tpu.memory_space<vmem>>, vector<1x32x4xbf16>
    %40 = vector.shape_cast %39 : vector<1x32x4xbf16> to vector<32x4xbf16>
    %cst_26 = arith.constant dense<0.000000e+00> : vector<32x288xf32>
    %41 = tpu.matmul %40, %38, %cst_26 {dimension_numbers = #tpu.dot_dimension_numbers<[1], [0], [0], [1], [0, 0, 1, 1], [], []>} : vector<32x4xbf16>, vector<4x288xbf16>, vector<32x288xf32> -> vector<32x288xf32>
    %42 = arith.addf %37, %41 : vector<32x288xf32>
    %43 = vector.extract_strided_slice %1 {offsets = [0, 38], sizes = [4, 288], strides = [1, 1]} : vector<4x384xbf16> to vector<4x288xbf16>
    %c8 = arith.constant 8 : index
    %c0_27 = arith.constant 0 : index
    %c0_28 = arith.constant 0 : index
    %44 = vector.load %arg2[%c8, %c0_27, %c0_28] : memref<9x32x4xbf16, #tpu.memory_space<vmem>>, vector<1x32x4xbf16>
    %45 = vector.shape_cast %44 : vector<1x32x4xbf16> to vector<32x4xbf16>
    %cst_29 = arith.constant dense<0.000000e+00> : vector<32x288xf32>
    %46 = tpu.matmul %45, %43, %cst_29 {dimension_numbers = #tpu.dot_dimension_numbers<[1], [0], [0], [1], [0, 0, 1, 1], [], []>} : vector<32x4xbf16>, vector<4x288xbf16>, vector<32x288xf32> -> vector<32x288xf32>
    %47 = arith.addf %42, %46 : vector<32x288xf32>
    %c0_30 = arith.constant 0 : index
    %c0_31 = arith.constant 0 : index
    %48 = vector.load %arg3[%c0_30, %c0_31] : memref<32x1xf32, #tpu.memory_space<vmem>>, vector<32x1xf32>
    %49 = vector.broadcast %48 : vector<32x1xf32> to vector<32x288xf32>
    %50 = arith.addf %47, %49 : vector<32x288xf32>
    %cst_32 = arith.constant 0.000000e+00 : f32
    %51 = vector.broadcast %cst_32 : f32 to vector<32x288xf32>
    %52 = arith.maximumf %50, %51 : vector<32x288xf32>
    %c0_33 = arith.constant 0 : index
    %c0_34 = arith.constant 0 : index
    %53 = vector.load %arg4[%c0_33, %c0_34] : memref<1x384xf32, #tpu.memory_space<vmem>>, vector<1x288xf32>
    %54 = vector.broadcast %53 : vector<1x288xf32> to vector<32x288xf32>
    %55 = arith.mulf %52, %54 : vector<32x288xf32>
    %cst_35 = arith.constant dense<0.000000e+00> : vector<32xf32>
    %56 = vector.multi_reduction <add>, %55, %cst_35 [1] : vector<32x288xf32> to vector<32xf32>
    %57 = vector.shape_cast %56 : vector<32xf32> to vector<32x1xf32>
    %c0_36 = arith.constant 0 : index
    %c0_37 = arith.constant 0 : index
    %58 = vector.load %arg5[%c0_36, %c0_37] : memref<128x32xbf16, #tpu.memory_space<vmem>>, vector<128x32xbf16>
    %59 = arith.truncf %57 : vector<32x1xf32> to vector<32x1xbf16>
    %cst_38 = arith.constant dense<0.000000e+00> : vector<128x1xf32>
    %60 = tpu.matmul %58, %59, %cst_38 {dimension_numbers = #tpu.dot_dimension_numbers<[1], [0], [0], [1], [0, 0, 1, 1], [], []>} : vector<128x32xbf16>, vector<32x1xbf16>, vector<128x1xf32> -> vector<128x1xf32>
    %c0_39 = arith.constant 0 : index
    %c0_40 = arith.constant 0 : index
    %61 = vector.load %arg6[%c0_39, %c0_40] : memref<128x1xf32, #tpu.memory_space<vmem>>, vector<128x1xf32>
    %62 = arith.addf %60, %61 : vector<128x1xf32>
    %63 = vector.shape_cast %62 : vector<128x1xf32> to vector<1x128x1xf32>
    %c0_41 = arith.constant 0 : index
    %c0_42 = arith.constant 0 : index
    %c0_43 = arith.constant 0 : index
    %64 = vector.load %arg7[%c0_41, %c0_42, %c0_43] : memref<1x128x1xf32, #tpu.memory_space<vmem>>, vector<1x128x1xf32>
    tpu.vector_store %arg7[%c0_41, %c0_42, %c0_43], %63 {strides = array<i32>} : memref<1x128x1xf32, #tpu.memory_space<vmem>>, vector<1x128x1xf32>,
    return
  }
  func.func @transform_0(%arg0: i32) -> (i32, i32, i32) {
    %c0_i32 = arith.constant 0 : i32
    %c0_i32_0 = arith.constant 0 : i32
    %c0_i32_1 = arith.constant 0 : i32
    return %arg0, %c0_i32, %c0_i32_0 : i32, i32, i32
  }
  func.func @transform_1(%arg0: i32) -> (i32, i32, i32) {
    %c0_i32 = arith.constant 0 : i32
    %c0_i32_0 = arith.constant 0 : i32
    %c0_i32_1 = arith.constant 0 : i32
    %c0_i32_2 = arith.constant 0 : i32
    return %c0_i32, %c0_i32_0, %c0_i32_1 : i32, i32, i32
  }
  func.func @transform_2(%arg0: i32) -> (i32, i32) {
    %c0_i32 = arith.constant 0 : i32
    %c0_i32_0 = arith.constant 0 : i32
    %c0_i32_1 = arith.constant 0 : i32
    return %c0_i32, %c0_i32_0 : i32, i32
  }
  func.func @transform_3(%arg0: i32) -> (i32, i32) {
    %c0_i32 = arith.constant 0 : i32
    %c0_i32_0 = arith.constant 0 : i32
    %c0_i32_1 = arith.constant 0 : i32
    return %c0_i32, %c0_i32_0 : i32, i32
  }
  func.func @transform_4(%arg0: i32) -> (i32, i32) {
    %c0_i32 = arith.constant 0 : i32
    %c0_i32_0 = arith.constant 0 : i32
    %c0_i32_1 = arith.constant 0 : i32
    return %c0_i32, %c0_i32_0 : i32, i32
  }
  func.func @transform_5(%arg0: i32) -> (i32, i32) {
    %c0_i32 = arith.constant 0 : i32
    %c0_i32_0 = arith.constant 0 : i32
    %c0_i32_1 = arith.constant 0 : i32
    return %c0_i32, %c0_i32_0 : i32, i32
  }
  func.func @transform_6(%arg0: i32) -> (i32, i32, i32) {
    %c0_i32 = arith.constant 0 : i32
    %c0_i32_0 = arith.constant 0 : i32
    %c0_i32_1 = arith.constant 0 : i32
    return %arg0, %c0_i32, %c0_i32_0 : i32, i32, i32
  }
}

module attributes {stable_mosaic.version = 11 : i64} {
  func.func @_decoder_kernel(%arg0: i32, %arg1: memref<8x128xbf16, #tpu.memory_space<vmem>>, %arg2: memref<128x512xbf16, #tpu.memory_space<vmem>>, %arg3: memref<1x512xf32, #tpu.memory_space<vmem>>, %arg4: memref<8x512xf32, #tpu.memory_space<vmem>>) attributes {dimension_semantics = [#tpu.dimension_semantics<parallel>], iteration_bounds = array<i64: 2>, scalar_prefetch = 0 : i64, scratch_operands = 0 : i64, tpu.core_type = #tpu.core_type<tc>, window_params = [{pipeline_mode = #tpu.pipeline_mode<synchronous>, transform_indices = @transform_0, window_bounds = array<i64: 8, 128>}, {transform_indices = @transform_1, window_bounds = array<i64: 128, 512>}, {transform_indices = @transform_2, window_bounds = array<i64: 1, 512>}, {transform_indices = @transform_3, window_bounds = array<i64: 8, 512>}]} {
    %c0 = arith.constant 0 : index
    %c0_0 = arith.constant 0 : index
    %0 = vector.load %arg1[%c0, %c0_0] : memref<8x128xbf16, #tpu.memory_space<vmem>>, vector<8x128xbf16>
    %c0_1 = arith.constant 0 : index
    %c0_2 = arith.constant 0 : index
    %1 = vector.load %arg2[%c0_1, %c0_2] : memref<128x512xbf16, #tpu.memory_space<vmem>>, vector<128x512xbf16>
    %cst = arith.constant dense<0.000000e+00> : vector<8x512xf32>
    %2 = tpu.matmul %0, %1, %cst {dimension_numbers = #tpu.dot_dimension_numbers<[1], [0], [0], [1], [0, 0, 1, 1], [], []>} : vector<8x128xbf16>, vector<128x512xbf16>, vector<8x512xf32> -> vector<8x512xf32>
    %c0_3 = arith.constant 0 : index
    %c0_4 = arith.constant 0 : index
    %3 = vector.load %arg3[%c0_3, %c0_4] : memref<1x512xf32, #tpu.memory_space<vmem>>, vector<1x512xf32>
    %4 = vector.broadcast %3 : vector<1x512xf32> to vector<8x512xf32>
    %5 = arith.addf %2, %4 : vector<8x512xf32>
    %c0_5 = arith.constant 0 : index
    %c0_6 = arith.constant 0 : index
    %6 = vector.load %arg4[%c0_5, %c0_6] : memref<8x512xf32, #tpu.memory_space<vmem>>, vector<8x512xf32>
    tpu.vector_store %arg4[%c0_5, %c0_6], %5 {strides = array<i32>} : memref<8x512xf32, #tpu.memory_space<vmem>>, vector<8x512xf32>,
    return
  }
  func.func @transform_0(%arg0: i32) -> (i32, i32) {
    %c0_i32 = arith.constant 0 : i32
    %c0_i32_0 = arith.constant 0 : i32
    %c0_i32_1 = arith.constant 0 : i32
    return %c0_i32, %c0_i32_0 : i32, i32
  }
  func.func @transform_1(%arg0: i32) -> (i32, i32) {
    %c0_i32 = arith.constant 0 : i32
    %c0_i32_0 = arith.constant 0 : i32
    return %c0_i32, %arg0 : i32, i32
  }
  func.func @transform_2(%arg0: i32) -> (i32, i32) {
    %c0_i32 = arith.constant 0 : i32
    %c0_i32_0 = arith.constant 0 : i32
    return %c0_i32, %arg0 : i32, i32
  }
  func.func @transform_3(%arg0: i32) -> (i32, i32) {
    %c0_i32 = arith.constant 0 : i32
    %c0_i32_0 = arith.constant 0 : i32
    return %c0_i32, %arg0 : i32, i32
  }
}

</mosaic_0001>

<bundles_post_ra>
// kernel: moco_forward.3
= control target key start
LH: loop header
LB: loop body
LE: loop exit
PB: predicated region body
PF: predicated region fallthrough
CT: control target
= control target key end

     0   :  { %s812_s12 = smov 0   ;;  %s814_s13 = smov 0   ;;  %s972_s0 = inlined_call_operand.vmem [shape: bf16[8,128], index: 0, kind: input, shape index: {}]   ;;  %s973_s1 = inlined_call_operand.vmem [shape: bf16[128,1024], index: 1, kind: input, shape index: {}]   ;;  %s974_s2 = inlined_call_operand.vmem [shape: f32[1,1024], index: 2, kind: input, shape index: {}]   ;;  %s975_s3 = inlined_call_operand.vmem [shape: f32[8,1024], index: 3, kind: output, shape index: {}]  }
   0x1   :  { %s816_s14 = smov 0  }
   0x2 LB: > { %s647_s15 = sadd.s32 4294967295, %s789_s14   ;;  %s829_s16 = sadd.s32 1, %s789_s14   ;;  %s789_s14 = sphi %s816_s14, %s978_s14   ;;  %s785_s13 = sphi %s814_s13, %s977_s13   ;;  %s781_s12 = sphi %s812_s12, %s976_s12  }
   0x3   : > { %s38_s17 = ssub.s32 %s789_s14, %s829_s16  ;;  %s41_s18 = sadd.s32 1, %s785_s13 }
   0x4   : > { %p39_p0 = scmp.eq.s32.totalorder %s38_s17, 0  ;;  %p48_p1 = scmp.ne.s32.totalorder %s785_s13, %s781_s12 }
   0x5   : > { %p49_p2 = scmp.eq.s32.totalorder %s789_s14, 0  ;;  %p650_p4 = scmp.ge.s32.totalorder %s789_s14, 2 }
   0x6   : > { %s838_s19 = scalar_select %p39_p0, %s785_s13, %s41_s18  }
   0x7   : > { %p50_p3 = por %p49_p2, %p48_p1  ;;  %129 = sbr.rel (%p650_p4) target bundleno = 34 (0x22), region = 20 }
   0xe   : > { %132 = sbr.rel (!%p50_p3) target bundleno = 34 (0x22), region = 24  ;;  %s134_s20 = sand.u32 (%p50_p3), 1, %s785_s13  }
   0xf   : > { %s693_s21 = sshll.u32 (%p50_p3), %s789_s14, 4  ;;  %s651_s22 = sshll.u32 (%p50_p3), %s134_s20, 8 }
  0x10   : > { %s846_s25 = scalar_lea.vmem (%p50_p3), %s973_s1, %s693_s21  ;;  %s851_s26 = scalar_lea.vmem (%p50_p3), [#allocation2], %s651_s22 }
  0x11   : > { %v152_v0 = vld [vmem:[%s846_s25] sm:$0xff] (%p50_p3)  ;;  %v154_v1 = vld [vmem:[%s846_s25 + $0x8] sm:$0xff] (%p50_p3) }
  0x12   : > { %v156_v2 = vld [vmem:[%s846_s25 + $0x20] sm:$0xff] (%p50_p3)  ;;  %153 = vst [vmem:[%s851_s26] sm:$0xff] (%p50_p3), %v152_v0  ;;  %155 = vst [vmem:[%s851_s26 + $0x8] sm:$0xff] (%p50_p3), %v154_v1  ;;  %v158_v3 = vld [vmem:[%s846_s25 + $0x28] sm:$0xff] (%p50_p3) }
  0x13   : > { %157 = vst [vmem:[%s851_s26 + $0x10] sm:$0xff] (%p50_p3), %v156_v2  ;;  %v160_v4 = vld [vmem:[%s846_s25 + $0x40] sm:$0xff] (%p50_p3)  ;;  %v162_v5 = vld [vmem:[%s846_s25 + $0x48] sm:$0xff] (%p50_p3)  ;;  %159 = vst [vmem:[%s851_s26 + $0x18] sm:$0xff] (%p50_p3), %v158_v3 }
  0x14   : > { %161 = vst [vmem:[%s851_s26 + $0x20] sm:$0xff] (%p50_p3), %v160_v4  ;;  %163 = vst [vmem:[%s851_s26 + $0x28] sm:$0xff] (%p50_p3), %v162_v5  ;;  %v164_v6 = vld [vmem:[%s846_s25 + $0x60] sm:$0xff] (%p50_p3)  ;;  %v166_v7 = vld [vmem:[%s846_s25 + $0x68] sm:$0xff] (%p50_p3) }
  0x15   : > { %v168_v8 = vld [vmem:[%s846_s25 + $0x80] sm:$0xff]  ;;  %165 = vst [vmem:[%s851_s26 + $0x30] sm:$0xff] %v164_v6  ;;  %167 = vst [vmem:[%s851_s26 + $0x38] sm:$0xff] %v166_v7  ;;  %v170_v9 = vld [vmem:[%s846_s25 + $0x88] sm:$0xff] }
  0x16   : > { %169 = vst [vmem:[%s851_s26 + $0x40] sm:$0xff] %v168_v8  ;;  %v172_v10 = vld [vmem:[%s846_s25 + $0xa0] sm:$0xff]  ;;  %v174_v11 = vld [vmem:[%s846_s25 + $0xa8] sm:$0xff]  ;;  %171 = vst [vmem:[%s851_s26 + $0x48] sm:$0xff] %v170_v9 }
  0x17   : > { %173 = vst [vmem:[%s851_s26 + $0x50] sm:$0xff] %v172_v10  ;;  %175 = vst [vmem:[%s851_s26 + $0x58] sm:$0xff] %v174_v11  ;;  %v176_v12 = vld [vmem:[%s846_s25 + $0xc0] sm:$0xff]  ;;  %v178_v13 = vld [vmem:[%s846_s25 + $0xc8] sm:$0xff] }
  0x18   : > { %v180_v14 = vld [vmem:[%s846_s25 + $0xe0] sm:$0xff]  ;;  %177 = vst [vmem:[%s851_s26 + $0x60] sm:$0xff] %v176_v12  ;;  %179 = vst [vmem:[%s851_s26 + $0x68] sm:$0xff] %v178_v13  ;;  %v182_v15 = vld [vmem:[%s846_s25 + $0xe8] sm:$0xff] }
  0x19   : > { %181 = vst [vmem:[%s851_s26 + $0x70] sm:$0xff] %v180_v14  ;;  %v184_v16 = vld [vmem:[%s846_s25 + $0x100] sm:$0xff]  ;;  %v186_v17 = vld [vmem:[%s846_s25 + $0x108] sm:$0xff]  ;;  %183 = vst [vmem:[%s851_s26 + $0x78] sm:$0xff] %v182_v15 }
  0x1a   : > { %185 = vst [vmem:[%s851_s26 + $0x80] sm:$0xff] %v184_v16  ;;  %187 = vst [vmem:[%s851_s26 + $0x88] sm:$0xff] %v186_v17  ;;  %v188_v18 = vld [vmem:[%s846_s25 + $0x120] sm:$0xff]  ;;  %v190_v19 = vld [vmem:[%s846_s25 + $0x128] sm:$0xff] }
  0x1b   : > { %v192_v20 = vld [vmem:[%s846_s25 + $0x140] sm:$0xff]  ;;  %189 = vst [vmem:[%s851_s26 + $0x90] sm:$0xff] %v188_v18  ;;  %191 = vst [vmem:[%s851_s26 + $0x98] sm:$0xff] %v190_v19  ;;  %v194_v21 = vld [vmem:[%s846_s25 + $0x148] sm:$0xff] }
  0x1c   : > { %193 = vst [vmem:[%s851_s26 + $0xa0] sm:$0xff] %v192_v20  ;;  %v196_v22 = vld [vmem:[%s846_s25 + $0x160] sm:$0xff]  ;;  %v198_v23 = vld [vmem:[%s846_s25 + $0x168] sm:$0xff]  ;;  %195 = vst [vmem:[%s851_s26 + $0xa8] sm:$0xff] %v194_v21 }
  0x1d   : > { %197 = vst [vmem:[%s851_s26 + $0xb0] sm:$0xff] %v196_v22  ;;  %199 = vst [vmem:[%s851_s26 + $0xb8] sm:$0xff] %v198_v23  ;;  %v200_v24 = vld [vmem:[%s846_s25 + $0x180] sm:$0xff]  ;;  %v202_v25 = vld [vmem:[%s846_s25 + $0x188] sm:$0xff] }
  0x1e   : > { %v204_v26 = vld [vmem:[%s846_s25 + $0x1a0] sm:$0xff]  ;;  %201 = vst [vmem:[%s851_s26 + $0xc0] sm:$0xff] %v200_v24  ;;  %203 = vst [vmem:[%s851_s26 + $0xc8] sm:$0xff] %v202_v25  ;;  %v206_v27 = vld [vmem:[%s846_s25 + $0x1a8] sm:$0xff] }
  0x1f   : > { %205 = vst [vmem:[%s851_s26 + $0xd0] sm:$0xff] %v204_v26  ;;  %v208_v28 = vld [vmem:[%s846_s25 + $0x1c0] sm:$0xff]  ;;  %v210_v29 = vld [vmem:[%s846_s25 + $0x1c8] sm:$0xff]  ;;  %207 = vst [vmem:[%s851_s26 + $0xd8] sm:$0xff] %v206_v27 }
  0x20   : > { %209 = vst [vmem:[%s851_s26 + $0xe0] sm:$0xff] %v208_v28  ;;  %211 = vst [vmem:[%s851_s26 + $0xe8] sm:$0xff] %v210_v29  ;;  %v212_v30 = vld [vmem:[%s846_s25 + $0x1e0] sm:$0xff]  ;;  %v214_v31 = vld [vmem:[%s846_s25 + $0x1e8] sm:$0xff] }
  0x21   : > { %213 = vst [vmem:[%s851_s26 + $0xf0] sm:$0xff] %v212_v30  ;;  %215 = vst [vmem:[%s851_s26 + $0xf8] sm:$0xff] %v214_v31 }
  0x22 PF: > { %p654_p5 = scmp.ge.s32.totalorder %s789_s14, 1  ;;  %p228_p6 = scmp.lt.s32.totalorder %s789_s14, 3 }
  0x24   : > { %p229_p7 = pnand %p654_p5, %p228_p6 }
  0x25   : > { %s235_s27 = sand.u32 (!%p229_p7), 1, %s781_s12   ;;  %v791_v32 = vmov (!%p229_p7), 0   ;;  %v275_v1 = vld [vmem:[%s972_s0] sm:$0xf] (!%p229_p7)  ;;  %s656_s5 = sshll.u32 (!%p229_p7), %s647_s15, 2  ;;  %v310_v2 = vlaneseq (!%p229_p7) }
  0x26   : > { %232 = sbr.rel (%p229_p7) target bundleno = 289 (0x121), region = 51  ;;  %s655_s28 = sshll.u32 (!%p229_p7), %s235_s27, 8  ;;  %522 = vmatprep.mubr.bf16.mxu0 (!%p229_p7), %v791_v32  ;;  %563 = vmatprep.mubr.bf16.mxu1 (!%p229_p7), %v791_v32 }
  0x27   : > { %s917_s29 = scalar_lea.vmem (!%p229_p7), [#allocation2], %s655_s28  ;;  %p264_p8 = scmp.lt.s32.totalorder (!%p229_p7), %s656_s5, 7  ;;  %v311_v3 = vshrl.u32 (!%p229_p7), %v310_v2, 7 }
  0x28   : > { %v719_v33 = vld [vmem:[%s917_s29 + $0x4] ss:$16 sps:$4 sm:$0xff] (!%p229_p7)   ;;  %v721_v34 = vld [vmem:[%s917_s29 + $0xc] ss:$16 sps:$4 sm:$0xff] (!%p229_p7)   ;;  %v723_v35 = vld [vmem:[%s917_s29] ss:$16 sps:$4 sm:$0xff] (!%p229_p7)  }
  0x29   : > { %490 = vmatprep.subr.bf16.mxu0 (!%p229_p7), %v719_v33  ;;  %v724_v36 = vld [vmem:[%s917_s29 + $0x8] ss:$16 sps:$4 sm:$0xff] (!%p229_p7)   ;;  %531 = vmatprep.subr.bf16.mxu1 (!%p229_p7), %v721_v34  ;;  %v725_v37 = vld [vmem:[%s917_s29 + $0x24] ss:$16 sps:$4 sm:$0xff] (!%p229_p7)   ;;  %v727_v38 = vld [vmem:[%s917_s29 + $0x2c] ss:$16 sps:$4 sm:$0xff] (!%p229_p7)  }
  0x2a   : > { %491 = vmatpush1.bf16.msra.mxu0 (!%p229_p7), %v723_v35  ;;  %532 = vmatpush1.bf16.msra.mxu1 (!%p229_p7), %v724_v36  ;;  %v729_v39 = vld [vmem:[%s917_s29 + $0x20] ss:$16 sps:$4 sm:$0xff] (!%p229_p7)   ;;  %v730_v40 = vld [vmem:[%s917_s29 + $0x28] ss:$16 sps:$4 sm:$0xff] (!%p229_p7)   ;;  %v731_v41 = vld [vmem:[%s917_s29 + $0x44] ss:$16 sps:$4 sm:$0xff] (!%p229_p7)  }
  0x2b   : > { %492 = vmatprep.subr.bf16.mxu0 (!%p229_p7), %v725_v37  ;;  %533 = vmatprep.subr.bf16.mxu1 (!%p229_p7), %v727_v38  ;;  %v733_v42 = vld [vmem:[%s917_s29 + $0x4c] ss:$16 sps:$4 sm:$0xff] (!%p229_p7)   ;;  %v735_v43 = vld [vmem:[%s917_s29 + $0x40] ss:$16 sps:$4 sm:$0xff] (!%p229_p7)   ;;  %v736_v44 = vld [vmem:[%s917_s29 + $0x48] ss:$16 sps:$4 sm:$0xff] (!%p229_p7)  }
  0x2c   : > { %v737_v45 = vld [vmem:[%s917_s29 + $0x64] ss:$16 sps:$4 sm:$0xff] (!%p229_p7)   ;;  %v739_v46 = vld [vmem:[%s917_s29 + $0x6c] ss:$16 sps:$4 sm:$0xff] (!%p229_p7)   ;;  %v741_v47 = vld [vmem:[%s917_s29 + $0x60] ss:$16 sps:$4 sm:$0xff] (!%p229_p7)  }
  0x2d   : > { %v742_v48 = vld [vmem:[%s917_s29 + $0x68] ss:$16 sps:$4 sm:$0xff]   ;;  %v743_v49 = vld [vmem:[%s917_s29 + $0x84] ss:$16 sps:$4 sm:$0xff]   ;;  %v745_v50 = vld [vmem:[%s917_s29 + $0x8c] ss:$16 sps:$4 sm:$0xff]  }
  0x2e   : > { %493 = vmatpush1.bf16.msra.mxu0 %v729_v39  ;;  %534 = vmatpush1.bf16.msra.mxu1 %v730_v40  ;;  %v747_v51 = vld [vmem:[%s917_s29 + $0x80] ss:$16 sps:$4 sm:$0xff]   ;;  %v748_v52 = vld [vmem:[%s917_s29 + $0x88] ss:$16 sps:$4 sm:$0xff]   ;;  %v749_v53 = vld [vmem:[%s917_s29 + $0xa4] ss:$16 sps:$4 sm:$0xff]  }
  0x2f   : > { %494 = vmatprep.subr.bf16.mxu0 %v731_v41  ;;  %535 = vmatprep.subr.bf16.mxu1 %v733_v42  ;;  %v751_v54 = vld [vmem:[%s917_s29 + $0xac] ss:$16 sps:$4 sm:$0xff]   ;;  %v753_v55 = vld [vmem:[%s917_s29 + $0xa0] ss:$16 sps:$4 sm:$0xff]   ;;  %v754_v56 = vld [vmem:[%s917_s29 + $0xa8] ss:$16 sps:$4 sm:$0xff]  }
  0x30   : > { %v755_v57 = vld [vmem:[%s917_s29 + $0xc4] ss:$16 sps:$4 sm:$0xff]   ;;  %v757_v58 = vld [vmem:[%s917_s29 + $0xcc] ss:$16 sps:$4 sm:$0xff]   ;;  %v759_v59 = vld [vmem:[%s917_s29 + $0xc0] ss:$16 sps:$4 sm:$0xff]  }
  0x31   : > { %v760_v60 = vld [vmem:[%s917_s29 + $0xc8] ss:$16 sps:$4 sm:$0xff]   ;;  %v761_v61 = vld [vmem:[%s917_s29 + $0xe4] ss:$16 sps:$4 sm:$0xff]   ;;  %v763_v62 = vld [vmem:[%s917_s29 + $0xec] ss:$16 sps:$4 sm:$0xff]  }
  0x32   : > { %495 = vmatpush1.bf16.msra.mxu0 %v735_v43  ;;  %536 = vmatpush1.bf16.msra.mxu1 %v736_v44  ;;  %v765_v63 = vld [vmem:[%s917_s29 + $0xe0] ss:$16 sps:$4 sm:$0xff]   ;;  %v766_v0 = vld [vmem:[%s917_s29 + $0xe8] ss:$16 sps:$4 sm:$0xff]   ;;  %s980_s5 = smov (!%p264_p8, %s656_s5), 7  ;;  %v312_v4 = vsub.s32 0, %v311_v3 }
  0x33   : > { %496 = vmatprep.subr.bf16.mxu0 %v737_v45  ;;  %537 = vmatprep.subr.bf16.mxu1 %v739_v46  ;;  %s266_s8 = scalar_lea.vmem %s974_s2, %s980_s5  ;;  %v320_v5 = vsub.s32 2, %v311_v3  ;;  %v316_v7 = vsub.s32 1, %v311_v3  ;;  %v324_v8 = vsub.s32 3, %v311_v3  ;;  %s658_s9 = sshll.u32 %s980_s5, 3 }
  0x34   : > { %v308_v6 = vld [vmem:[%s266_s8] sm:$0xf]  ;;  %s272_s12 = scalar_lea.vmem %s975_s3, %s658_s9 }
  0x35   : > { %v313_v9 = vrot.slane %v308_v6, %v312_v4  ;;  %v321_v10 = vrot.slane %v308_v6, %v320_v5  ;;  %v317_v11 = vrot.slane %v308_v6, %v316_v7  ;;  %v325_v12 = vrot.slane %v308_v6, %v324_v8 }
  0x36   : > { %497 = vmatpush1.bf16.msra.mxu0 %v741_v47  ;;  %538 = vmatpush1.bf16.msra.mxu1 %v742_v48 }
  0x37   : > { %498 = vmatprep.subr.bf16.mxu0 %v743_v49  ;;  %539 = vmatprep.subr.bf16.mxu1 %v745_v50 }
  0x3a   : > { %499 = vmatpush1.bf16.msra.mxu0 %v747_v51  ;;  %540 = vmatpush1.bf16.msra.mxu1 %v748_v52 }
  0x3b   : > { %500 = vmatprep.subr.bf16.mxu0 %v749_v53  ;;  %541 = vmatprep.subr.bf16.mxu1 %v751_v54 }
  0x3e   : > { %501 = vmatpush1.bf16.msra.mxu0 %v753_v55  ;;  %542 = vmatpush1.bf16.msra.mxu1 %v754_v56 }
  0x3f   : > { %502 = vmatprep.subr.bf16.mxu0 %v755_v57  ;;  %543 = vmatprep.subr.bf16.mxu1 %v757_v58 }
  0x42   : > { %503 = vmatpush1.bf16.msra.mxu0 %v759_v59  ;;  %544 = vmatpush1.bf16.msra.mxu1 %v760_v60 }
  0x43   : > { %504 = vmatprep.subr.bf16.mxu0 %v761_v61  ;;  %545 = vmatprep.subr.bf16.mxu1 %v763_v62 }
  0x46   : > { %505 = vmatpush1.bf16.msra.mxu0 %v765_v63  ;;  %546 = vmatpush1.bf16.msra.mxu1 %v766_v0 }
  0x49   : > { %523 = vmatmul.mubr.bf16.vlgmr.msra.gmra.mrb[0].mxu0 %v275_v1  ;;  %564 = vmatmul.mubr.bf16.vlgmr.msra.gmra.mrb[0].mxu1 %v275_v1 }
 0x11c   : > { %v524_v13 = vpop.f32.mrb[0].mxu0  ;;  %v565_v14 = vpop.f32.mrb[0].mxu1 }
 0x11d   : > { %v525_v15 = vadd.f32 %v524_v13, %v313_v9  ;;  %v566_v16 = vadd.f32 %v565_v14, %v321_v10  ;;  %v526_v17 = vpop.f32.mrb[1].mxu0  ;;  %v567_v18 = vpop.f32.mrb[1].mxu1 }
 0x11e   : > { %v527_v19 = vadd.f32 %v526_v17, %v317_v11  ;;  %v568_v20 = vadd.f32 %v567_v18, %v325_v12  ;;  %v528_v21 = vpop.f32.mrb[2].mxu0  ;;  %v569_v22 = vpop.f32.mrb[2].mxu1 }
 0x11f   : > { %572 = vst [vmem:[%s272_s12] sm:$0xff] %v525_v15  ;;  %v529_v23 = vpop.f32.mrb[3].mxu0  ;;  %v570_v24 = vpop.f32.mrb[3].mxu1  ;;  %574 = vst [vmem:[%s272_s12 + $0x10] sm:$0xff] %v566_v16 }
 0x120   : > { %573 = vst [vmem:[%s272_s12 + $0x8] sm:$0xff] %v527_v19  ;;  %575 = vst [vmem:[%s272_s12 + $0x18] sm:$0xff] %v568_v20 }
 0x121 PF: > { %p10_p9 = scmp.ge.s32.totalorder %s829_s16, 4   ;;  %s976_s12 = smov %s785_s13 }
 0x122   : > { %s977_s13 = smov %s838_s19  ;;  %s978_s14 = smov %s829_s16 }
 0x123   :  { %12 = sbr.rel (!%p10_p9) target bundleno = 2 (0x2), region = 93 }

// kernel: moco_forward.2
= control target key start
LH: loop header
LB: loop body
LE: loop exit
PB: predicated region body
PF: predicated region fallthrough
CT: control target
= control target key end

     0   :  { %s2420_s21 = smov 0   ;;  %s2754_s0 = inlined_call_operand.vmem [shape: bf16[2,4,384], index: 0, kind: input, shape index: {}]   ;;  %s2755_s1 = inlined_call_operand.vmem [shape: bf16[9,32,4], index: 1, kind: input, shape index: {}]   ;;  %s2756_s2 = inlined_call_operand.vmem [shape: f32[32,1], index: 2, kind: input, shape index: {}]   ;;  %s2757_s3 = inlined_call_operand.vmem [shape: f32[1,384], index: 3, kind: input, shape index: {}]   ;;  %s2758_s4 = inlined_call_operand.vmem [shape: bf16[128,32], index: 4, kind: input, shape index: {}]   ;;  %s2759_s5 = inlined_call_operand.vmem [shape: f32[128,1], index: 5, kind: input, shape index: {}]   ;;  %s2760_s6 = inlined_call_operand.vmem [shape: f32[2,128,1], index: 6, kind: output, shape index: {}]  }
   0x1 LB: > { %s1981_s22 = sadd.s32 4294967295, %s2373_s21   ;;  %p1985_p0 = scmp.ge.s32.totalorder %s2373_s21, 1  ;;  %s2373_s21 = sphi %s2420_s21, %s16_s21  }
   0x2   : > { %p212_p1 = scmp.lt.s32.totalorder %s2373_s21, 3 }
   0x4   : > { %p213_p2 = pnand %p1985_p0, %p212_p1 }
   0x5   : > { %p242_p3 = scmp.lt.s32.totalorder (!%p213_p2), %s1981_s22, 1  ;;  %v278_v0 = vlaneseq (!%p213_p2)  ;;  %v2375_v1 = vmov (!%p213_p2), 1983009808   ;;  %v2376_v3 = vmov (!%p213_p2), 0   ;;  %vm306_vm0 = vcmask (!%p213_p2), 1041408   ;;  %s2377_s27 = smov (!%p213_p2), 127  }
   0x6   : > { %216 = sbr.rel (%p213_p2) target bundleno = 874 (0x36a), region = 44  ;;  %v276_v2 = vunpack.c.l.s4 (!%p213_p2), %v2375_v1  ;;  %475 = vmatprep.mubr.bf16.mxu0 (!%p213_p2), %v2376_v3  ;;  %348 = vmatprep.mubr.bf16.mxu1 (!%p213_p2), %v2376_v3  ;;  %vm299_vm1 = vcmask (!%p213_p2), 31744   ;;  %v2449_v13 = vld [vmem:[%s2755_s1] sm:$0xff] (!%p213_p2)   ;;  %s2378_s30 = smov (!%p213_p2), 126   ;;  %v2457_v14 = vld [vmem:[%s2755_s1 + $0x8] sm:$0xff] (!%p213_p2)   ;;  %v1618_v17 = vld [vmem:[%s2756_s2 + $0x10] sm:$0xff] (!%p213_p2) }
   0x7   : > { %v2432_v4 = vshrl.u32 (!%p213_p2), %v278_v0, 7  ;;  %2338 = vset.pattern.permute.xlu0 (!%p213_p2), %v2376_v3  ;;  %2339 = vset.pattern.permute.xlu1 (!%p213_p2), %v2376_v3  ;;  %s2379_s9 = smov (!%p213_p2), 110   ;;  %s2380_s10 = smov (!%p213_p2), 109   ;;  %v1616_v15 = vld [vmem:[%s2756_s2] sm:$0xff] (!%p213_p2)  ;;  %v1617_v16 = vld [vmem:[%s2756_s2 + $0x8] sm:$0xff] (!%p213_p2)  ;;  %v1619_v18 = vld [vmem:[%s2756_s2 + $0x18] sm:$0xff] (!%p213_p2) }
   0x8   : > { %v277_v5 = vunpack.c.0.s8 (!%p213_p2), %v276_v2  ;;  %s2381_s11 = smov (!%p213_p2), 108   ;;  %s2382_s12 = smov (!%p213_p2), 92   ;;  %vm296_vm2 = vcmask (!%p213_p2), 1039360   ;;  %vm566_vm3 = vcmask (!%p213_p2), 1031168   ;;  %v2343_v26 = vld [vmem:[%s2755_s1 + $0x10] sm:$0xff] (!%p213_p2)   ;;  %v2344_v33 = vld [vmem:[%s2755_s1 + $0x20] sm:$0xff] (!%p213_p2)  }
   0x9   : > { %s2383_s13 = smov (!%p213_p2), 91   ;;  %s2384_s14 = smov (!%p213_p2), 90   ;;  %vm719_vm4 = vcmask (!%p213_p2), 900096   ;;  %v2345_v35 = vld [vmem:[%s2755_s1 + $0x18] sm:$0xff] (!%p213_p2)   ;;  %v2346_v42 = vld [vmem:[%s2755_s1 + $0x28] sm:$0xff] (!%p213_p2)   ;;  %vm872_vm5 = vcmask (!%p213_p2), 891904  }
   0xa   : > { %v280_v6 = vsub.s32 (!%p213_p2), %v277_v5, %v2432_v4  ;;  %v2347_v49 = vld [vmem:[%s2755_s1 + $0x30] sm:$0xff] (!%p213_p2)   ;;  %vm1025_vm6 = vcmask (!%p213_p2), 883712   ;;  %v2348_v54 = vld [vmem:[%s2755_s1 + $0x38] sm:$0xff] (!%p213_p2)   ;;  %v2349_v58 = vld [vmem:[%s2755_s1 + $0x40] sm:$0xff] (!%p213_p2)   ;;  %vm1178_vm7 = vcmask (!%p213_p2), 752640   ;;  %vm1331_vm8 = vcmask (!%p213_p2), 744448  }
   0xb   : > { %v2350_v0 = vld [vmem:[%s2755_s1 + $0x48] sm:$0xff] (!%p213_p2)   ;;  %v2351_v5 = vld [vmem:[%s2755_s1 + $0x50] sm:$0xff] (!%p213_p2)   ;;  %vm1484_vm9 = vcmask (!%p213_p2), 736256   ;;  %vm1694_vm10 = vcmask (!%p213_p2), 261120   ;;  %vm1909_vm11 = vcmask (!%p213_p2), 7168  }
   0xd   : > { %s2762_s22 = smov (!%p242_p3, %s1981_s22), 1 }
   0xe   : > { %s2319_s23 = smul.u32 6, %s2762_s22  ;;  %s2102_s7 = sshll.u32 %s2762_s22, 7 }
  0x10   : > { %s246_s26 = scalar_lea.vmem %s2754_s0, %s2319_s23 }
  0x11   : > { %v253_v7 = vld [vmem:[%s246_s26] sm:$0x3f] }
  0x12   : > { %v281_v8 = vrot.slane %v253_v7, %v280_v6  ;;  %v274_v9 = vcombine.high %v253_v7, %v253_v7 }
  0x14   : > { %290 = vrot.lane.b32.xlu0 %v281_v8, %s2377_s27  ;;  %v2441_v10 = vrot.slane %v274_v9, %v280_v6  ;;  %v289_v11 = vcombine.high %v281_v8, %v281_v8  ;;  %v435_v12 = vsel %vm306_vm0, %v281_v8, 0 }
  0x16   : > { %294 = vrot.lane.b32.xlu1 %v2441_v10, %s2377_s27  ;;  %2002 = vmatprep.subr.msk.bf16.mxu0 %vm306_vm0, %v289_v11  ;;  %v441_v46 = vsel %vm306_vm0, %v2441_v10, 0 }
  0x17   : > { %444 = vmatpush1.bf16.msra.mxu0 %v435_v12 }
  0x18   : > { %292 = vrot.lane.b32.xlu0 %v289_v11, %s2377_s27 }
  0x1a   : > { %560 = vrot.lane.b32.xlu1 %v281_v8, %s2378_s30  ;;  %2003 = vmatmul.mubr.msk.bf16.vlgmr.msra.gmra.mrb[0].mxu0 %vm299_vm1, %v2449_v13 }
  0x1b   : > { %485 = vmatprep.mubr.bf16.mxu0 %v2376_v3 }
  0x1c   : > { %562 = vrot.lane.b32.xlu0 %v289_v11, %s2378_s30 }
  0x1e   : > { %564 = vrot.lane.b32.xlu1 %v2441_v10, %s2378_s30 }
  0x20   : > { %713 = vrot.lane.b32.xlu0 %v281_v8, %s2379_s9 }
  0x22   : > { %715 = vrot.lane.b32.xlu1 %v289_v11, %s2379_s9  ;;  %2004 = vmatmul.mubr.msk.bf16.gmra.mrb[4].mxu0 %vm299_vm1, %v2457_v14 }
  0x23   : > { %616 = vmatprep.mubr.bf16.mxu0 %v2376_v3 }
  0x24   : > { %717 = vrot.lane.b32.xlu0 %v2441_v10, %s2379_s9 }
  0x26   : > { %866 = vrot.lane.b32.xlu1 %v281_v8, %s2380_s10 }
  0x28   : > { %868 = vrot.lane.b32.xlu0 %v289_v11, %s2380_s10 }
  0x2a   : > { %870 = vrot.lane.b32.xlu1 %v2441_v10, %s2380_s10 }
  0x2c   : > { %1019 = vrot.lane.b32.xlu0 %v281_v8, %s2381_s11 }
  0x2e   : > { %1021 = vrot.lane.b32.xlu1 %v289_v11, %s2381_s11 }
  0x30   : > { %1023 = vrot.lane.b32.xlu0 %v2441_v10, %s2381_s11 }
  0x32   : > { %1172 = vrot.lane.b32.xlu1 %v281_v8, %s2382_s12 }
  0x34   : > { %1174 = vrot.lane.b32.xlu0 %v289_v11, %s2382_s12 }
  0x36   : > { %1176 = vrot.lane.b32.xlu1 %v2441_v10, %s2382_s12 }
  0x38   : > { %1325 = vrot.lane.b32.xlu0 %v281_v8, %s2383_s13 }
  0x3a   : > { %1327 = vrot.lane.b32.xlu1 %v289_v11, %s2383_s13 }
  0x3c   : > { %1329 = vrot.lane.b32.xlu0 %v2441_v10, %s2383_s13 }
  0x3e   : > { %1478 = vrot.lane.b32.xlu1 %v281_v8, %s2384_s14 }
  0x40   : > { %1480 = vrot.lane.b32.xlu0 %v289_v11, %s2384_s14  ;;  %v2352_v11 = vld [vmem:[%s2755_s1 + $0x58] sm:$0xff]  }
  0x42   : > { %1482 = vrot.lane.b32.xlu1 %v2441_v10, %s2384_s14  ;;  %s2675_s14 = scalar_lea.vmem %s2760_s6, %s2102_s7 }
  0x44   : > { %1622 = vperm.xlu0 %2338, %v1616_v15   ;;  %v2353_v15 = vld [vmem:[%s2755_s1 + $0x60] sm:$0xff]  }
  0x46   : > { %1627 = vperm.xlu1 %2339, %v1617_v16  }
  0x48   : > { %1637 = vperm.xlu0 %2338, %v1619_v18  }
  0x4a   : > { %1632 = vperm.xlu1 %2339, %v1618_v17  }
  0x86   : > { %v291_v19 = vpop.permute.xlu0 %290 }
  0x88   : > { %v295_v20 = vpop.permute.xlu1 %294 }
  0x89   : > { %v314_v31 = vsel %vm306_vm0, %v295_v20, 0 }
  0x8a   : > { %v293_v21 = vpop.permute.xlu0 %292 }
  0x8b   : > { %v298_v22 = vsel %vm296_vm2, %v293_v21, %v295_v20  ;;  %v297_v23 = vsel %vm296_vm2, %v291_v19, %v293_v21 }
  0x8c   : > { %1995 = vmatprep.subr.msk.bf16.mxu1 %vm306_vm0, %v298_v22  ;;  %v561_v24 = vpop.permute.xlu1 %560  ;;  %v308_v25 = vsel %vm306_vm0, %v297_v23, 0  ;;  %v2355_v23 = vld [vmem:[%s2755_s1 + $0x70] sm:$0xff]  }
  0x8d   : > { %317 = vmatpush1.bf16.msra.mxu1 %v308_v25 }
  0x8e   : > { %v563_v27 = vpop.permute.xlu0 %562  ;;  %2310 = vmatprep.subr.msk.bf16.mxu1 %vm306_vm0, %v295_v20  ;;  %v2354_v20 = vld [vmem:[%s2755_s1 + $0x68] sm:$0xff]  }
  0x8f   : > { %v567_v28 = vsel %vm566_vm3, %v561_v24, %v563_v27 }
  0x90   : > { %v576_v29 = vsel %vm306_vm0, %v567_v28, 0  ;;  %1996 = vmatmul.mubr.msk.bf16.vlgmr.msra.gmra.mrb[0].mxu1 %vm299_vm1, %v2343_v26  ;;  %v565_v30 = vpop.permute.xlu1 %564  ;;  %v2357_v28 = vld [vmem:[%s2755_s1 + $0x80] sm:$0xff]  }
  0x91   : > { %2141 = vmatpush3.bf16.msra.mxu1 %v314_v31  ;;  %v568_v32 = vsel %vm566_vm3, %v563_v27, %v565_v30  ;;  %358 = vmatprep.mubr.bf16.mxu1 %v2376_v3  ;;  %v582_v55 = vsel %vm306_vm0, %v565_v30, 0 }
  0x92   : > { %2013 = vmatprep.subr.msk.bf16.mxu0 %vm306_vm0, %v568_v32  ;;  %v714_v34 = vpop.permute.xlu0 %713  ;;  %2311 = vmatprep.subr.msk.bf16.mxu1 %vm306_vm0, %v2441_v10 }
  0x93   : > { %585 = vmatpush1.bf16.msra.mxu0 %v576_v29  ;;  %v2358_v29 = vld [vmem:[%s2755_s1 + $0x88] sm:$0xff]  }
  0x94   : > { %v716_v36 = vpop.permute.xlu1 %715 }
  0x95   : > { %v720_v37 = vsel %vm719_vm4, %v714_v34, %v716_v36 }
  0x96   : > { %2014 = vmatmul.mubr.msk.bf16.vlgmr.msra.gmra.mrb[0].mxu0 %vm299_vm1, %v2344_v33  ;;  %v718_v38 = vpop.permute.xlu0 %717  ;;  %v729_v39 = vsel %vm306_vm0, %v720_v37, 0 }
  0x97   : > { %v721_v40 = vsel %vm719_vm4, %v716_v36, %v718_v38  ;;  %626 = vmatprep.mubr.bf16.mxu0 %v2376_v3  ;;  %v735_v63 = vsel %vm306_vm0, %v718_v38, 0 }
  0x98   : > { %1997 = vmatmul.mubr.msk.bf16.gmra.mrb[4].mxu1 %vm299_vm1, %v2345_v35  ;;  %2024 = vmatprep.subr.msk.bf16.mxu0 %vm306_vm0, %v721_v40  ;;  %v867_v41 = vpop.permute.xlu1 %866  ;;  %v1664_v40 = vld [vmem:[%s2757_s3] sm:$0x7] }
  0x99   : > { %2142 = vmatprep.mubr.msk.bf16.mxu1 %vm299_vm1, %v2343_v26  ;;  %738 = vmatpush1.bf16.msra.mxu0 %v729_v39  ;;  %v2356_v26 = vld [vmem:[%s2755_s1 + $0x78] sm:$0xff]  }
  0x9a   : > { %v869_v43 = vpop.permute.xlu0 %868 }
  0x9b   : > { %v873_v48 = vsel %vm872_vm5, %v867_v41, %v869_v43  ;;  %v1672_v41 = vsub.s32 1, %v2432_v4 }
  0x9c   : > { %v871_v44 = vpop.permute.xlu1 %870  ;;  %v882_v52 = vsel %vm306_vm0, %v873_v48, 0 }
  0x9d   : > { %v874_v45 = vsel %vm872_vm5, %v869_v43, %v871_v44  ;;  %v888_v8 = vsel %vm306_vm0, %v871_v44, 0 }
  0x9e   : > { %2015 = vmatmul.mubr.msk.bf16.gmra.mrb[4].mxu0 %vm299_vm1, %v2346_v42  ;;  %2035 = vmatprep.subr.msk.bf16.mxu0 %vm306_vm0, %v874_v45  ;;  %v1020_v47 = vpop.permute.xlu0 %1019 }
  0x9f   : > { %769 = vmatprep.mubr.bf16.mxu0 %v2376_v3 }
  0xa0   : > { %2143 = vmatmul.mubr.msk.bf16.vlgmr.msra.gmra.mrb[8].mxu1 %vm299_vm1, %v2345_v35  ;;  %v1022_v51 = vpop.permute.xlu1 %1021 }
  0xa1   : > { %2147 = vmatpush3.bf16.msra.mxu1 %v441_v46  ;;  %2148 = vmatprep.mubr.msk.bf16.mxu1 %vm299_vm1, %v2449_v13  ;;  %v1026_v57 = vsel %vm1025_vm6, %v1020_v47, %v1022_v51 }
  0xa2   : > { %2312 = vmatprep.subr.msk.bf16.mxu1 %vm306_vm0, %v565_v30  ;;  %v1024_v50 = vpop.permute.xlu0 %1023  ;;  %v1035_v61 = vsel %vm306_vm0, %v1026_v57, 0 }
  0xa3   : > { %v1027_v53 = vsel %vm1025_vm6, %v1022_v51, %v1024_v50  ;;  %v1041_v13 = vsel %vm306_vm0, %v1024_v50, 0 }
  0xa4   : > { %v1173_v56 = vpop.permute.xlu1 %1172 }
  0xa6   : > { %2025 = vmatmul.mubr.msk.bf16.vlgmr.msra.gmra.mrb[0].mxu0 %vm299_vm1, %v2347_v49  ;;  %v1175_v59 = vpop.permute.xlu0 %1174 }
  0xa7   : > { %779 = vmatprep.mubr.bf16.mxu0 %v2376_v3  ;;  %891 = vmatpush1.bf16.msra.mxu0 %v882_v52  ;;  %v1179_v2 = vsel %vm1178_vm7, %v1173_v56, %v1175_v59 }
  0xa8   : > { %2046 = vmatprep.subr.msk.bf16.mxu0 %vm306_vm0, %v1027_v53  ;;  %v1177_v60 = vpop.permute.xlu1 %1176  ;;  %v1188_v9 = vsel %vm306_vm0, %v1179_v2, 0  ;;  %v1673_v53 = vrot.slane %v1664_v40, %v1672_v41 }
  0xa9   : > { %v1180_v62 = vsel %vm1178_vm7, %v1175_v59, %v1177_v60  ;;  %v1194_v21 = vsel %vm306_vm0, %v1177_v60, 0 }
  0xaa   : > { %v1326_v1 = vpop.permute.xlu0 %1325 }
  0xac   : > { %2149 = vmatmul.mubr.msk.bf16.vlgmr.msra.gmra.mrb[8].mxu1 %vm299_vm1, %v2457_v14  ;;  %v1328_v7 = vpop.permute.xlu1 %1327 }
  0xad   : > { %2153 = vmatpush3.bf16.msra.mxu1 %v582_v55  ;;  %2154 = vmatprep.mubr.msk.bf16.mxu1 %vm299_vm1, %v2344_v33  ;;  %v1332_v14 = vsel %vm1331_vm8, %v1326_v1, %v1328_v7 }
  0xae   : > { %2313 = vmatprep.subr.msk.bf16.mxu1 %vm306_vm0, %v718_v38  ;;  %2026 = vmatmul.mubr.msk.bf16.gmra.mrb[4].mxu0 %vm299_vm1, %v2348_v54  ;;  %v1330_v6 = vpop.permute.xlu0 %1329  ;;  %v1341_v18 = vsel %vm306_vm0, %v1332_v14, 0  ;;  %v1668_v38 = vsub.s32 0, %v2432_v4 }
  0xaf   : > { %922 = vmatprep.mubr.bf16.mxu0 %v2376_v3  ;;  %v1333_v10 = vsel %vm1331_vm8, %v1328_v7, %v1330_v6  ;;  %v1347_v25 = vsel %vm306_vm0, %v1330_v6, 0 }
  0xb0   : > { %v1479_v12 = vpop.permute.xlu1 %1478 }
  0xb2   : > { %v1481_v16 = vpop.permute.xlu0 %1480 }
  0xb3   : > { %v1485_v22 = vsel %vm1484_vm9, %v1479_v12, %v1481_v16 }
  0xb4   : > { %v1483_v17 = vpop.permute.xlu1 %1482  ;;  %v1494_v24 = vsel %vm306_vm0, %v1485_v22, 0 }
  0xb5   : > { %v1486_v19 = vsel %vm1484_vm9, %v1481_v16, %v1483_v17  ;;  %v1500_v27 = vsel %vm306_vm0, %v1483_v17, 0 }
  0xb6   : > { %2036 = vmatmul.mubr.msk.bf16.vlgmr.msra.gmra.mrb[0].mxu0 %vm299_vm1, %v2349_v58 }
  0xb7   : > { %932 = vmatprep.mubr.bf16.mxu0 %v2376_v3  ;;  %1044 = vmatpush1.bf16.msra.mxu0 %v1035_v61 }
  0xb8   : > { %2155 = vmatmul.mubr.msk.bf16.vlgmr.msra.gmra.mrb[8].mxu1 %vm299_vm1, %v2346_v42  ;;  %2057 = vmatprep.subr.msk.bf16.mxu0 %vm306_vm0, %v1180_v62 }
  0xb9   : > { %2159 = vmatpush3.bf16.msra.mxu1 %v735_v63  ;;  %2160 = vmatprep.mubr.msk.bf16.mxu1 %vm299_vm1, %v2347_v49 }
  0xba   : > { %2314 = vmatprep.subr.msk.bf16.mxu1 %vm306_vm0, %v871_v44 }
  0xbe   : > { %2037 = vmatmul.mubr.msk.bf16.gmra.mrb[4].mxu0 %vm299_vm1, %v2350_v0 }
  0xbf   : > { %1075 = vmatprep.mubr.bf16.mxu0 %v2376_v3 }
  0xc4   : > { %2161 = vmatmul.mubr.msk.bf16.vlgmr.msra.gmra.mrb[8].mxu1 %vm299_vm1, %v2348_v54 }
  0xc5   : > { %2165 = vmatpush3.bf16.msra.mxu1 %v888_v8  ;;  %2166 = vmatprep.mubr.msk.bf16.mxu1 %vm299_vm1, %v2349_v58  ;;  %v1628_v46 = vpop.permute.xlu1 %1627  ;;  %v1676_v58 = vsub.s32 2, %v2432_v4 }
  0xc6   : > { %2315 = vmatprep.subr.msk.bf16.mxu1 %vm306_vm0, %v1024_v50  ;;  %2047 = vmatmul.mubr.msk.bf16.vlgmr.msra.gmra.mrb[0].mxu0 %vm299_vm1, %v2351_v5  ;;  %v1669_v50 = vrot.slane %v1664_v40, %v1668_v38 }
  0xc7   : > { %1085 = vmatprep.mubr.bf16.mxu0 %v2376_v3  ;;  %1197 = vmatpush1.bf16.msra.mxu0 %v1188_v9 }
  0xc8   : > { %2068 = vmatprep.subr.msk.bf16.mxu0 %vm306_vm0, %v1333_v10  ;;  %v1677_v10 = vrot.slane %v1664_v40, %v1676_v58 }
  0xc9   : > { %v1633_v63 = vpop.permute.xlu1 %1632 }
  0xce   : > { %2048 = vmatmul.mubr.msk.bf16.gmra.mrb[4].mxu0 %vm299_vm1, %v2352_v11 }
  0xcf   : > { %1228 = vmatprep.mubr.bf16.mxu0 %v2376_v3 }
  0xd0   : > { %2167 = vmatmul.mubr.msk.bf16.vlgmr.msra.gmra.mrb[8].mxu1 %vm299_vm1, %v2350_v0 }
  0xd1   : > { %2171 = vmatpush3.bf16.msra.mxu1 %v1041_v13  ;;  %2172 = vmatprep.mubr.msk.bf16.mxu1 %vm299_vm1, %v2351_v5 }
  0xd2   : > { %2316 = vmatprep.subr.msk.bf16.mxu1 %vm306_vm0, %v1177_v60 }
  0xd6   : > { %2058 = vmatmul.mubr.msk.bf16.vlgmr.msra.gmra.mrb[0].mxu0 %vm299_vm1, %v2353_v15 }
  0xd7   : > { %1238 = vmatprep.mubr.bf16.mxu0 %v2376_v3  ;;  %1350 = vmatpush1.bf16.msra.mxu0 %v1341_v18 }
  0xd8   : > { %2079 = vmatprep.subr.msk.bf16.mxu0 %vm306_vm0, %v1486_v19 }
  0xdc   : > { %2173 = vmatmul.mubr.msk.bf16.vlgmr.msra.gmra.mrb[8].mxu1 %vm299_vm1, %v2352_v11 }
  0xdd   : > { %2177 = vmatpush3.bf16.msra.mxu1 %v1194_v21  ;;  %2178 = vmatprep.mubr.msk.bf16.mxu1 %vm299_vm1, %v2353_v15 }
  0xde   : > { %2059 = vmatmul.mubr.msk.bf16.gmra.mrb[4].mxu0 %vm299_vm1, %v2354_v20  ;;  %2317 = vmatprep.subr.msk.bf16.mxu1 %vm306_vm0, %v1330_v6 }
  0xdf   : > { %1381 = vmatprep.mubr.bf16.mxu0 %v2376_v3 }
  0xe6   : > { %2069 = vmatmul.mubr.msk.bf16.vlgmr.msra.gmra.mrb[0].mxu0 %vm299_vm1, %v2355_v23 }
  0xe7   : > { %1391 = vmatprep.mubr.bf16.mxu0 %v2376_v3  ;;  %1503 = vmatpush1.bf16.msra.mxu0 %v1494_v24 }
  0xe8   : > { %2179 = vmatmul.mubr.msk.bf16.vlgmr.msra.gmra.mrb[8].mxu1 %vm299_vm1, %v2354_v20 }
  0xe9   : > { %2183 = vmatpush3.bf16.msra.mxu1 %v1347_v25  ;;  %2184 = vmatprep.mubr.msk.bf16.mxu1 %vm299_vm1, %v2355_v23 }
  0xea   : > { %2318 = vmatprep.subr.msk.bf16.mxu1 %vm306_vm0, %v1483_v17 }
  0xee   : > { %2070 = vmatmul.mubr.msk.bf16.gmra.mrb[4].mxu0 %vm299_vm1, %v2356_v26 }
  0xef   : > { %1534 = vmatprep.mubr.bf16.mxu0 %v2376_v3 }
  0xf4   : > { %2185 = vmatmul.mubr.msk.bf16.vlgmr.msra.gmra.mrb[8].mxu1 %vm299_vm1, %v2356_v26 }
  0xf5   : > { %2189 = vmatpush3.bf16.msra.mxu1 %v1500_v27  ;;  %2190 = vmatprep.mubr.msk.bf16.mxu1 %vm299_vm1, %v2357_v28 }
  0xf6   : > { %2080 = vmatmul.mubr.msk.bf16.vlgmr.msra.gmra.mrb[0].mxu0 %vm299_vm1, %v2357_v28 }
  0xf7   : > { %1544 = vmatprep.mubr.bf16.mxu0 %v2376_v3  ;;  %v1623_v3 = vpop.permute.xlu0 %1622 }
  0xfb   : > { %v1638_v5 = vpop.permute.xlu0 %1637 }
  0xfe   : > { %2081 = vmatmul.mubr.msk.bf16.gmra.mrb[4].mxu0 %vm299_vm1, %v2358_v29 }
 0x100   : > { %2191 = vmatmul.mubr.msk.bf16.vlgmr.msra.gmra.mrb[8].mxu1 %vm299_vm1, %v2358_v29 }
 0x163   : > { %v350_v30 = vpop.f32.mrb[0].mxu1 }
 0x164   : > { %v352_v31 = vpop.f32.mrb[1].mxu1 }
 0x165   : > { %v354_v32 = vpop.f32.mrb[2].mxu1 }
 0x166   : > { %v356_v33 = vpop.f32.mrb[3].mxu1 }
 0x16b   : > { %v360_v34 = vpop.f32.mrb[4].mxu1 }
 0x16c   : > { %v362_v35 = vpop.f32.mrb[5].mxu1 }
 0x16d   : > { %v364_v36 = vpop.f32.mrb[6].mxu1 }
 0x16e   : > { %v366_v37 = vpop.f32.mrb[7].mxu1 }
 0x1c9   : > { %v1536_v39 = vpop.f32.mrb[0].mxu0 }
 0x1ca   : > { %v2214_v42 = vadd.f32 %v1536_v39, %v350_v30  ;;  %v1538_v43 = vpop.f32.mrb[1].mxu0 }
 0x1cb   : > { %v2215_v44 = vadd.f32 %v1538_v43, %v352_v31  ;;  %v1540_v45 = vpop.f32.mrb[2].mxu0 }
 0x1cc   : > { %v1640_v47 = vadd.f32 %v2214_v42, %v1623_v3  ;;  %v2216_v48 = vadd.f32 %v1540_v45, %v354_v32  ;;  %v1542_v49 = vpop.f32.mrb[3].mxu0 }
 0x1cd   : > { %v1641_v51 = vadd.f32 %v2215_v44, %v1623_v3  ;;  %v2217_v52 = vadd.f32 %v1542_v49, %v356_v33 }
 0x1ce   : > { %v1652_v54 = vmax.f32 %v1640_v47, 0.0  ;;  %v1643_v55 = vadd.f32 %v2216_v48, %v1628_v46 }
 0x1cf   : > { %v1653_v56 = vmax.f32 %v1641_v51, 0.0  ;;  %v1644_v57 = vadd.f32 %v2217_v52, %v1628_v46 }
 0x1d0   : > { %v1655_v59 = vmax.f32 %v1643_v55, 0.0  ;;  %v1681_v60 = vmul.f32 %v1669_v50, %v1652_v54 }
 0x1d1   : > { %v1656_v61 = vmax.f32 %v1644_v57, 0.0  ;;  %v1546_v62 = vpop.f32.mrb[4].mxu0  ;;  %v1682_v0 = vmul.f32 %v1673_v53, %v1653_v56 }
 0x1d2   : > { %v2218_v1 = vadd.f32 %v1546_v62, %v360_v34  ;;  %v1548_v2 = vpop.f32.mrb[5].mxu0  ;;  %v1684_v6 = vmul.f32 %v1669_v50, %v1655_v59  ;;  %v2360_v59 = vld [vmem:[%s2758_s4 + $0x8] sm:$0xff]   ;;  %v2363_v62 = vld [vmem:[%s2758_s4 + $0x20] sm:$0xff]  }
 0x1d3   : > { %v2219_v7 = vadd.f32 %v1548_v2, %v362_v35  ;;  %v1550_v8 = vpop.f32.mrb[6].mxu0  ;;  %v2192_v9 = vpop.f32.mrb[8].mxu1  ;;  %v1693_v11 = vadd.f32 %v1682_v0, %v1681_v60  ;;  %v1685_v12 = vmul.f32 %v1673_v53, %v1656_v61  ;;  %v2361_v60 = vld [vmem:[%s2758_s4 + $0x10] sm:$0xff]   ;;  %v2362_v61 = vld [vmem:[%s2758_s4 + $0x18] sm:$0xff]  }
 0x1d4   : > { %v2220_v13 = vadd.f32 %v1550_v8, %v364_v36  ;;  %v1646_v14 = vadd.f32 %v2218_v1, %v1633_v63  ;;  %v1648_v15 = vadd.f32 %v2192_v9, %v1633_v63  ;;  %v1552_v4 = vpop.f32.mrb[7].mxu0  ;;  %v1589_v16 = vpop.f32.mrb[9].mxu1  ;;  %v2365_v0 = vld [vmem:[%s2758_s4 + $0x30] sm:$0xff]   ;;  %v2366_v1 = vld [vmem:[%s2758_s4 + $0x38] sm:$0xff]  }
 0x1d5   : > { %v1647_v17 = vadd.f32 %v2219_v7, %v1633_v63  ;;  %v2221_v18 = vadd.f32 %v1552_v4, %v366_v37  ;;  %v1642_v19 = vadd.f32 %v1623_v3, %v1589_v16  ;;  %v2193_v20 = vpop.f32.mrb[10].mxu1  ;;  %v1699_v21 = vadd.f32 %v1685_v12, %v1684_v6  ;;  %v2364_v63 = vld [vmem:[%s2758_s4 + $0x28] sm:$0xff]   ;;  %v1734_v2 = vld [vmem:[%s2759_s5 + $0x10] sm:$0xff]  ;;  %v1735_v7 = vld [vmem:[%s2759_s5 + $0x18] sm:$0xff] }
 0x1d6   : > { %v1658_v22 = vmax.f32 %v1646_v14, 0.0  ;;  %v1660_v23 = vmax.f32 %v1648_v15, 0.0  ;;  %v1649_v24 = vadd.f32 %v2220_v13, %v1638_v5  ;;  %v1651_v25 = vadd.f32 %v2193_v20, %v1638_v5  ;;  %v1592_v26 = vpop.f32.mrb[11].mxu1  ;;  %v1738_v4 = vld [vmem:[%s2759_s5 + $0x30] sm:$0xff]  ;;  %v1736_v16 = vld [vmem:[%s2759_s5 + $0x20] sm:$0xff] }
 0x1d7   : > { %v1659_v27 = vmax.f32 %v1647_v17, 0.0  ;;  %v1654_v28 = vmax.f32 %v1642_v19, 0.0  ;;  %v1650_v29 = vadd.f32 %v2221_v18, %v1638_v5  ;;  %v1645_v30 = vadd.f32 %v1628_v46, %v1592_v26  ;;  %v1732_v5 = vld [vmem:[%s2759_s5] sm:$0xff]  ;;  %v1739_v18 = vld [vmem:[%s2759_s5 + $0x38] sm:$0xff] }
 0x1d8   : > { %v1689_v31 = vmul.f32 %v1677_v10, %v1660_v23  ;;  %v1661_v32 = vmax.f32 %v1649_v24, 0.0  ;;  %v1663_v33 = vmax.f32 %v1651_v25, 0.0  ;;  %v1687_v34 = vmul.f32 %v1669_v50, %v1658_v22 }
 0x1d9   : > { %v1683_v35 = vmul.f32 %v1677_v10, %v1654_v28  ;;  %v1662_v36 = vmax.f32 %v1650_v29, 0.0  ;;  %v1657_v38 = vmax.f32 %v1645_v30, 0.0  ;;  %v1688_v37 = vmul.f32 %v1673_v53, %v1659_v27  ;;  %v1742_v27 = vld [vmem:[%s2759_s5 + $0x50] sm:$0xff]  ;;  %v1740_v28 = vld [vmem:[%s2759_s5 + $0x40] sm:$0xff]  ;;  %v1743_v30 = vld [vmem:[%s2759_s5 + $0x58] sm:$0xff] }
 0x1da   : > { %v1692_v39 = vmul.f32 %v1677_v10, %v1663_v33  ;;  %v1690_v3 = vmul.f32 %v1669_v50, %v1661_v32  ;;  %v1705_v45 = vsel %vm1694_vm10, %v1689_v31, 0.0  ;;  %v2359_v50 = vld [vmem:[%s2758_s4] sm:$0xff]   ;;  %v1741_v33 = vld [vmem:[%s2759_s5 + $0x48] sm:$0xff] }
 0x1db   : > { %v1686_v40 = vmul.f32 %v1677_v10, %v1657_v38  ;;  %v1695_v41 = vsel %vm1694_vm10, %v1683_v35, 0.0  ;;  %v1691_v42 = vmul.f32 %v1673_v53, %v1662_v36  ;;  %v1704_v43 = vadd.f32 %v1688_v37, %v1687_v34  ;;  %2198 = vmatprep.mubr.msk.bf16.mxu1 %vm1694_vm10, %v2359_v50  ;;  %v1733_v10 = vld [vmem:[%s2759_s5 + $0x8] sm:$0xff] }
 0x1dc   : > { %v1696_v44 = vadd.f32 %v1695_v41, %v1693_v11  ;;  %v1710_v51 = vsel %vm1694_vm10, %v1692_v39, 0.0  ;;  %v1746_v39 = vld [vmem:[%s2759_s5 + $0x70] sm:$0xff]  ;;  %v1747_v41 = vld [vmem:[%s2759_s5 + $0x78] sm:$0xff] }
 0x1dd   : > { %v1700_v46 = vsel %vm1694_vm10, %v1686_v40, 0.0  ;;  %v1709_v47 = vadd.f32 %v1691_v42, %v1690_v3  ;;  %v1706_v48 = vadd.f32 %v1705_v45, %v1704_v43  ;;  %v1744_v3 = vld [vmem:[%s2759_s5 + $0x60] sm:$0xff] }
 0x1de   : > { %1697 = vadd.xlane.f32.xlu1 %v1696_v44  ;;  %v1701_v49 = vadd.f32 %v1700_v46, %v1699_v21  ;;  %v1737_v21 = vld [vmem:[%s2759_s5 + $0x28] sm:$0xff] }
 0x1df   : > { %v1711_v52 = vadd.f32 %v1710_v51, %v1709_v47  ;;  %v1745_v44 = vld [vmem:[%s2759_s5 + $0x68] sm:$0xff] }
 0x1e0   : > { %1702 = vadd.xlane.f32.xlu0 %v1701_v49 }
 0x1e2   : > { %1712 = vadd.xlane.f32.xlu1 %v1711_v52 }
 0x1e4   : > { %1707 = vadd.xlane.f32.xlu0 %v1706_v48 }
 0x26b   : > { %v1698_v53 = vpop.xlane.xlu1 %1697 }
 0x26d   : > { %v1703_v54 = vpop.xlane.xlu0 %1702 }
 0x26e   : > { %v1730_v55 = vpack.c.bf16 %v1703_v54, %v1698_v53 }
 0x26f   : > { %v1713_v56 = vpop.xlane.xlu1 %1712 }
 0x270   : > { %2194 = vmatprep.subr.bf16.mxu1 %v1730_v55 }
 0x271   : > { %2195 = vmatpush3.bf16.msra.mxu1 %v1730_v55  ;;  %v1708_v57 = vpop.xlane.xlu0 %1707 }
 0x272   : > { %v1731_v58 = vpack.c.bf16 %v1713_v56, %v1708_v57 }
 0x274   : > { %2196 = vmatprep.subr.bf16.mxu1 %v1731_v58 }
 0x275   : > { %2197 = vmatpush3.bf16.msra.mxu1 %v1731_v58 }
 0x278   : > { %2199 = vmatmul.mubr.msk.bf16.vlgmr.msra.gmra.mrb[12].mxu1 %vm1694_vm10, %v2360_v59 }
 0x279   : > { %2202 = vmatprep.mubr.msk.bf16.mxu1 %vm1694_vm10, %v2361_v60 }
 0x280   : > { %2203 = vmatmul.mubr.msk.bf16.gmra.mrb[16].mxu1 %vm1694_vm10, %v2362_v61 }
 0x281   : > { %2206 = vmatprep.mubr.msk.bf16.mxu1 %vm1694_vm10, %v2363_v62 }
 0x288   : > { %2207 = vmatmul.mubr.msk.bf16.gmra.mrb[20].mxu1 %vm1694_vm10, %v2364_v63 }
 0x289   : > { %2210 = vmatprep.mubr.msk.bf16.mxu1 %vm1694_vm10, %v2365_v0 }
 0x290   : > { %2211 = vmatmul.mubr.msk.bf16.gmra.mrb[24].mxu1 %vm1694_vm10, %v2366_v1 }
 0x34b   : > { %v2200_v6 = vpop.f32.mrb[12].mxu1 }
 0x34c   : > { %v1855_v8 = vadd.f32 %v2200_v6, %v1734_v2  ;;  %v1846_v9 = vpop.f32.mrb[13].mxu1 }
 0x34d   : > { %v1847_v11 = vadd.f32 %v1846_v9, %v1732_v5  ;;  %v2201_v12 = vpop.f32.mrb[14].mxu1 }
 0x34e   : > { %1912 = vst.msk [vmem:[%s2675_s14 + $0x10] sm:$0xff] %vm1909_vm11, %v1855_v8  ;;  %v1858_v13 = vadd.f32 %v2201_v12, %v1735_v7  ;;  %v1849_v14 = vpop.f32.mrb[15].mxu1 }
 0x34f   : > { %1910 = vst.msk [vmem:[%s2675_s14] sm:$0xff] %vm1909_vm11, %v1847_v11  ;;  %v1850_v15 = vadd.f32 %v1849_v14, %v1733_v10 }
 0x350   : > { %1913 = vst.msk [vmem:[%s2675_s14 + $0x18] sm:$0xff] %vm1909_vm11, %v1858_v13 }
 0x351   : > { %1911 = vst.msk [vmem:[%s2675_s14 + $0x8] sm:$0xff] %vm1909_vm11, %v1850_v15 }
 0x353   : > { %v2204_v17 = vpop.f32.mrb[16].mxu1 }
 0x354   : > { %v1871_v19 = vadd.f32 %v2204_v17, %v1738_v4  ;;  %v1862_v20 = vpop.f32.mrb[17].mxu1 }
 0x355   : > { %v1863_v22 = vadd.f32 %v1862_v20, %v1736_v16  ;;  %v2205_v23 = vpop.f32.mrb[18].mxu1 }
 0x356   : > { %1916 = vst.msk [vmem:[%s2675_s14 + $0x30] sm:$0xff] %vm1909_vm11, %v1871_v19  ;;  %v1874_v24 = vadd.f32 %v2205_v23, %v1739_v18  ;;  %v1865_v25 = vpop.f32.mrb[19].mxu1 }
 0x357   : > { %1914 = vst.msk [vmem:[%s2675_s14 + $0x20] sm:$0xff] %vm1909_vm11, %v1863_v22  ;;  %v1866_v26 = vadd.f32 %v1865_v25, %v1737_v21 }
 0x358   : > { %1917 = vst.msk [vmem:[%s2675_s14 + $0x38] sm:$0xff] %vm1909_vm11, %v1874_v24 }
 0x359   : > { %1915 = vst.msk [vmem:[%s2675_s14 + $0x28] sm:$0xff] %vm1909_vm11, %v1866_v26 }
 0x35b   : > { %v2208_v29 = vpop.f32.mrb[20].mxu1 }
 0x35c   : > { %v1887_v31 = vadd.f32 %v2208_v29, %v1742_v27  ;;  %v1878_v32 = vpop.f32.mrb[21].mxu1 }
 0x35d   : > { %v1879_v34 = vadd.f32 %v1878_v32, %v1740_v28  ;;  %v2209_v35 = vpop.f32.mrb[22].mxu1 }
 0x35e   : > { %1920 = vst.msk [vmem:[%s2675_s14 + $0x50] sm:$0xff] %vm1909_vm11, %v1887_v31  ;;  %v1890_v36 = vadd.f32 %v2209_v35, %v1743_v30  ;;  %v1881_v38 = vpop.f32.mrb[23].mxu1 }
 0x35f   : > { %1918 = vst.msk [vmem:[%s2675_s14 + $0x40] sm:$0xff] %vm1909_vm11, %v1879_v34  ;;  %v1882_v37 = vadd.f32 %v1881_v38, %v1741_v33 }
 0x360   : > { %1921 = vst.msk [vmem:[%s2675_s14 + $0x58] sm:$0xff] %vm1909_vm11, %v1890_v36 }
 0x361   : > { %1919 = vst.msk [vmem:[%s2675_s14 + $0x48] sm:$0xff] %vm1909_vm11, %v1882_v37 }
 0x363   : > { %v2212_v40 = vpop.f32.mrb[24].mxu1 }
 0x364   : > { %v1903_v42 = vadd.f32 %v2212_v40, %v1746_v39  ;;  %v1894_v43 = vpop.f32.mrb[25].mxu1 }
 0x365   : > { %v1895_v45 = vadd.f32 %v1894_v43, %v1744_v3  ;;  %v2213_v46 = vpop.f32.mrb[26].mxu1 }
 0x366   : > { %1924 = vst.msk [vmem:[%s2675_s14 + $0x70] sm:$0xff] %vm1909_vm11, %v1903_v42  ;;  %v1906_v47 = vadd.f32 %v2213_v46, %v1747_v41  ;;  %v1897_v48 = vpop.f32.mrb[27].mxu1 }
 0x367   : > { %1922 = vst.msk [vmem:[%s2675_s14 + $0x60] sm:$0xff] %vm1909_vm11, %v1895_v45  ;;  %v1898_v49 = vadd.f32 %v1897_v48, %v1745_v44 }
 0x368   : > { %1925 = vst.msk [vmem:[%s2675_s14 + $0x78] sm:$0xff] %vm1909_vm11, %v1906_v47 }
 0x369   : > { %1923 = vst.msk [vmem:[%s2675_s14 + $0x68] sm:$0xff] %vm1909_vm11, %v1898_v49 }
 0x36a PF: > { %s16_s21 = sadd.s32 1, %s2373_s21  }
 0x36b   : > { %p13_p4 = scmp.ge.s32.totalorder %s16_s21, 4  }
 0x36d   :  { %15 = sbr.rel (!%p13_p4) target bundleno = 1 (0x1), region = 82 }

</bundles_post_ra>
